<compile_context>
chip_gen: v6e
topology: v6e:2x2x1
jax: 0.10.0
libtpu: 0.0.40
codegen_flags: <defaults>
</compile_context>

<pallas_src>
import math
import jax
import jax.numpy as jnp
from jax.experimental import pallas as pl
from jax.experimental.pallas import tpu as pltpu

Z_DIM = 2
HID = 64
FUSED_IN = 2 * HID            # 128 : [text | image] features
FIELD = 128                   # lane width of each layer-2 param field
N_FIELDS = 4                  # mu_own, sigma_raw_own, mu_other, sigma_raw_other
W2_COLS = N_FIELDS * FIELD    # 512


def _round_up(n, m):
    return ((n + m - 1) // m) * m


def _ambiguity_kernel(x_ref, eps_ref, w1_ref, b1_ref, w2_ref, b2_ref, out_ref):
    # ---- layer 1: block-diagonal fusion of both heads (one 128-wide matmul) ----
    h = jnp.dot(x_ref[...], w1_ref[...], preferred_element_type=jnp.float32) + b1_ref[...]
    h = jnp.maximum(h, 0.0)                       # ReLU(True)

    # ---- layer 2: one [TB,128]x[128,512] matmul -> four lane-aligned fields ----
    #   field 0: mu_own        (lanes 0-1: mu1,    lanes 2-3: mu2)
    #   field 1: sigma_raw_own (lanes 0-1: s1_raw, lanes 2-3: s2_raw)
    #   field 2: mu_other      (lanes 0-1: mu2,    lanes 2-3: mu1)
    #   field 3: sigma_raw_oth (lanes 0-1: s2_raw, lanes 2-3: s1_raw)
    p = jnp.dot(h, w2_ref[...], preferred_element_type=jnp.float32) + b2_ref[...]

    mu_own = p[:, 0 * FIELD:1 * FIELD]            # 128-aligned slices: pure vreg-column views
    sr_own = p[:, 1 * FIELD:2 * FIELD]
    mu_oth = p[:, 2 * FIELD:3 * FIELD]
    sr_oth = p[:, 3 * FIELD:4 * FIELD]

    s_own = jax.nn.softplus(sr_own) + 1e-7
    s_oth = jax.nn.softplus(sr_oth) + 1e-7
    log_s_own = jnp.log(s_own)                    # each log(sigma) computed exactly once
    log_s_oth = jnp.log(s_oth)
    inv_s_oth = pl.reciprocal(s_oth, approx=False)

    # rsample: z = mu + sigma * eps. eps slab carries eps1 at lanes 0-1, eps2 at lanes 2-3.
    eps = eps_ref[...]
    z = mu_own + s_own * eps                      # z1 at lanes 0-1, z2 at lanes 2-3

    # cross-distribution whitened residual, lane-aligned thanks to the "other" fields:
    #   lanes 0-1: (z1 - mu2)/s2 ; lanes 2-3: (z2 - mu1)/s1
    cross = (z - mu_oth) * inv_s_oth

    # logN(z|own) - logN(z|other): (z - mu_own)/s_own == eps exactly, 0.5*log(2*pi) cancels.
    contrib = 0.5 * (cross * cross - eps * eps) + (log_s_oth - log_s_own)

    lane = jax.lax.broadcasted_iota(jnp.int32, contrib.shape, 1)
    kl_1_2 = jnp.sum(jnp.where(lane < Z_DIM, contrib, 0.0), axis=-1, keepdims=True)
    kl_2_1 = jnp.sum(jnp.where((lane >= Z_DIM) & (lane < 2 * Z_DIM), contrib, 0.0),
                     axis=-1, keepdims=True)

    # single lane-dense output slab: lanes 0-63 = sigmoid(kl_1_2), lanes 64-127 = sigmoid(kl_2_1)
    out_ref[...] = jnp.where(lane < FIELD // 2,
                             jax.nn.sigmoid(kl_1_2), jax.nn.sigmoid(kl_2_1))


def pack_params(p):
    """Pack per-head weights into the fused block-diagonal / 4-field layout."""
    Z, H, F = Z_DIM, HID, FIELD

    w1 = jnp.zeros((FUSED_IN, FUSED_IN), jnp.float32)
    w1 = w1.at[:H, :H].set(p["w1t"]).at[H:, H:].set(p["w1i"])
    b1 = jnp.concatenate([p["b1t"], p["b1i"]], axis=1)          # [1, 128]

    w2 = jnp.zeros((FUSED_IN, W2_COLS), jnp.float32)
    b2 = jnp.zeros((1, W2_COLS), jnp.float32)
    # (field, lane offset, head feeding those lanes, source column slice of the head's W2)
    placements = [
        (0, 0, "t", slice(0, Z)),     (0, Z, "i", slice(0, Z)),      # mu_own
        (1, 0, "t", slice(Z, 2 * Z)), (1, Z, "i", slice(Z, 2 * Z)),  # sigma_raw_own
        (2, 0, "i", slice(0, Z)),     (2, Z, "t", slice(0, Z)),      # mu_other
        (3, 0, "i", slice(Z, 2 * Z)), (3, Z, "t", slice(Z, 2 * Z)),  # sigma_raw_other
    ]
    for field, lane0, head, cols in placements:
        w_src = p["w2t"][:, cols] if head == "t" else p["w2i"][:, cols]
        b_src = p["b2t"][:, cols] if head == "t" else p["b2i"][:, cols]
        rows = slice(0, H) if head == "t" else slice(H, 2 * H)
        c0 = field * F + lane0
        w2 = w2.at[rows, c0:c0 + Z].set(w_src)
        b2 = b2.at[:, c0:c0 + Z].set(b_src)
    return dict(w1=w1, b1=b1, w2=w2, b2=b2)


def ambiguity_learning(text_encoding, image_encoding, fused, eps1, eps2, *, block_rows=512):
    """text_encoding/image_encoding: [B, 64] f32; eps*: [B, 2] f32. Returns two [B] arrays."""
    B = text_encoding.shape[0]
    x = jnp.concatenate([text_encoding, image_encoding], axis=1).astype(jnp.float32)  # [B,128]
    eps = jnp.zeros((B, FIELD), jnp.float32)
    eps = eps.at[:, 0:Z_DIM].set(eps1).at[:, Z_DIM:2 * Z_DIM].set(eps2)

    tb = min(block_rows, _round_up(B, 8))
    bp = _round_up(B, tb)
    if bp != B:                                   # ragged last tile -> zero-pad batch
        pad = ((0, bp - B), (0, 0))
        x = jnp.pad(x, pad)
        eps = jnp.pad(eps, pad)

    out = pl.pallas_call(
        _ambiguity_kernel,
        out_shape=jax.ShapeDtypeStruct((bp, FIELD), jnp.float32),
        grid=(bp // tb,),
        in_specs=[
            pl.BlockSpec((tb, FIELD), lambda i: (i, 0)),           # fused [text|image]
            pl.BlockSpec((tb, FIELD), lambda i: (i, 0)),           # fused eps slab
            pl.BlockSpec((FUSED_IN, FUSED_IN), lambda i: (0, 0)),  # W1 (block-diag)
            pl.BlockSpec((1, FUSED_IN), lambda i: (0, 0)),         # b1
            pl.BlockSpec((FUSED_IN, W2_COLS), lambda i: (0, 0)),   # W2 (4-field)
            pl.BlockSpec((1, W2_COLS), lambda i: (0, 0)),          # b2
        ],
        out_specs=pl.BlockSpec((tb, FIELD), lambda i: (i, 0)),
        compiler_params=pltpu.CompilerParams(
            dimension_semantics=("parallel",)),
    )(x, eps, fused["w1"], fused["b1"], fused["w2"], fused["b2"])

    return out[:B, 0], out[:B, FIELD // 2]


def init_params(key):
    """Deterministic synthetic init matching Normal_mapping shapes.
    Weights stored as [in_features, out_features] so the math is x @ W."""
    ks = jax.random.split(key, 8)

    def lin(kw, kb, fan_in, fan_out):
        bound = 1.0 / math.sqrt(fan_in)
        w = jax.random.uniform(kw, (fan_in, fan_out), jnp.float32, -bound, bound)
        b = jax.random.uniform(kb, (1, fan_out), jnp.float32, -bound, bound)
        return w, b

    w1t, b1t = lin(ks[0], ks[1], HID, HID)
    w2t, b2t = lin(ks[2], ks[3], HID, 2 * Z_DIM)
    w1i, b1i = lin(ks[4], ks[5], HID, HID)
    w2i, b2i = lin(ks[6], ks[7], HID, 2 * Z_DIM)
    return dict(w1t=w1t, b1t=b1t, w2t=w2t, b2t=b2t,
                w1i=w1i, b1i=b1i, w2i=w2i, b2i=b2i)


def reference(text, image, params, eps1, eps2):
    """Pure-JAX reference (literal PyTorch semantics) for sanity checking."""
    def mlp(x, w1, b1, w2, b2):
        h = jnp.maximum(x @ w1 + b1, 0.0)
        return h @ w2 + b2

    p1 = mlp(text, params["w1t"], params["b1t"], params["w2t"], params["b2t"])
    p2 = mlp(image, params["w1i"], params["b1i"], params["w2i"], params["b2i"])
    mu1, s1 = p1[:, :Z_DIM], jax.nn.softplus(p1[:, Z_DIM:]) + 1e-7
    mu2, s2 = p2[:, :Z_DIM], jax.nn.softplus(p2[:, Z_DIM:]) + 1e-7
    z1 = mu1 + s1 * eps1
    z2 = mu2 + s2 * eps2

    def lp(z, mu, s):
        t = (z - mu) / s
        return jnp.sum(-0.5 * t * t - jnp.log(s) - 0.5 * math.log(2 * math.pi), -1)

    return (jax.nn.sigmoid(lp(z1, mu1, s1) - lp(z1, mu2, s2)),
            jax.nn.sigmoid(lp(z2, mu2, s2) - lp(z2, mu1, s1)))


if __name__ == "__main__":
    key = jax.random.PRNGKey(0)
    k_param, k_text, k_img, k_e1, k_e2 = jax.random.split(key, 5)

    B = 8
    params = init_params(k_param)
    fused = pack_params(params)
    text_encoding = jax.random.normal(k_text, (B, HID), jnp.float32)
    image_encoding = jax.random.normal(k_img, (B, HID), jnp.float32)
    # rsample noise generated host-side for determinism (eps ~ N(0, 1))
    eps1 = jax.random.normal(k_e1, (B, Z_DIM), jnp.float32)
    eps2 = jax.random.normal(k_e2, (B, Z_DIM), jnp.float32)

    out12, out21 = ambiguity_learning(text_encoding, image_encoding, fused, eps1, eps2)
    jax.block_until_ready((out12, out21))

    ref12, ref21 = reference(text_encoding, image_encoding, params, eps1, eps2)
    assert out12.shape == (B,) and out21.shape == (B,)
    assert jnp.allclose(out12, ref12, atol=1e-5, rtol=1e-5)
    assert jnp.allclose(out21, ref21, atol=1e-5, rtol=1e-5)

    print("KERNEL_OK")
</pallas_src>

<mosaic_0001>
module attributes {stable_mosaic.version = 11 : i64} {
  func.func @_ambiguity_kernel(%arg0: i32, %arg1: memref<8x128xf32, #tpu.memory_space<vmem>>, %arg2: memref<8x128xf32, #tpu.memory_space<vmem>>, %arg3: memref<128x128xf32, #tpu.memory_space<vmem>>, %arg4: memref<1x128xf32, #tpu.memory_space<vmem>>, %arg5: memref<128x512xf32, #tpu.memory_space<vmem>>, %arg6: memref<1x512xf32, #tpu.memory_space<vmem>>, %arg7: memref<8x128xf32, #tpu.memory_space<vmem>>) attributes {dimension_semantics = [#tpu.dimension_semantics<parallel>], iteration_bounds = array<i64: 1>, scalar_prefetch = 0 : i64, scratch_operands = 0 : i64, tpu.core_type = #tpu.core_type<tc>, window_params = [{transform_indices = @transform_0, window_bounds = array<i64: 8, 128>}, {transform_indices = @transform_1, window_bounds = array<i64: 8, 128>}, {pipeline_mode = #tpu.pipeline_mode<synchronous>, transform_indices = @transform_2, window_bounds = array<i64: 128, 128>}, {pipeline_mode = #tpu.pipeline_mode<synchronous>, transform_indices = @transform_3, window_bounds = array<i64: 1, 128>}, {pipeline_mode = #tpu.pipeline_mode<synchronous>, transform_indices = @transform_4, window_bounds = array<i64: 128, 512>}, {pipeline_mode = #tpu.pipeline_mode<synchronous>, transform_indices = @transform_5, window_bounds = array<i64: 1, 512>}, {transform_indices = @transform_6, window_bounds = array<i64: 8, 128>}]} {
    %c0 = arith.constant 0 : index
    %c0_0 = arith.constant 0 : index
    %0 = vector.load %arg1[%c0, %c0_0] : memref<8x128xf32, #tpu.memory_space<vmem>>, vector<8x128xf32>
    %c0_1 = arith.constant 0 : index
    %c0_2 = arith.constant 0 : index
    %1 = vector.load %arg3[%c0_1, %c0_2] : memref<128x128xf32, #tpu.memory_space<vmem>>, vector<128x128xf32>
    %cst = arith.constant dense<0.000000e+00> : vector<8x128xf32>
    %2 = tpu.matmul %0, %1, %cst {dimension_numbers = #tpu.dot_dimension_numbers<[1], [0], [0], [1], [0, 0, 1, 1], [], []>} : vector<8x128xf32>, vector<128x128xf32>, vector<8x128xf32> -> vector<8x128xf32>
    %c0_3 = arith.constant 0 : index
    %c0_4 = arith.constant 0 : index
    %3 = vector.load %arg4[%c0_3, %c0_4] : memref<1x128xf32, #tpu.memory_space<vmem>>, vector<1x128xf32>
    %4 = vector.broadcast %3 : vector<1x128xf32> to vector<8x128xf32>
    %5 = arith.addf %2, %4 : vector<8x128xf32>
    %cst_5 = arith.constant 0.000000e+00 : f32
    %6 = vector.broadcast %cst_5 : f32 to vector<8x128xf32>
    %7 = arith.maximumf %5, %6 : vector<8x128xf32>
    %c0_6 = arith.constant 0 : index
    %c0_7 = arith.constant 0 : index
    %8 = vector.load %arg5[%c0_6, %c0_7] : memref<128x512xf32, #tpu.memory_space<vmem>>, vector<128x512xf32>
    %cst_8 = arith.constant dense<0.000000e+00> : vector<8x512xf32>
    %9 = tpu.matmul %7, %8, %cst_8 {dimension_numbers = #tpu.dot_dimension_numbers<[1], [0], [0], [1], [0, 0, 1, 1], [], []>} : vector<8x128xf32>, vector<128x512xf32>, vector<8x512xf32> -> vector<8x512xf32>
    %c0_9 = arith.constant 0 : index
    %c0_10 = arith.constant 0 : index
    %10 = vector.load %arg6[%c0_9, %c0_10] : memref<1x512xf32, #tpu.memory_space<vmem>>, vector<1x512xf32>
    %11 = vector.broadcast %10 : vector<1x512xf32> to vector<8x512xf32>
    %12 = arith.addf %9, %11 : vector<8x512xf32>
    %13 = vector.extract_strided_slice %12 {offsets = [0, 0], sizes = [8, 128], strides = [1, 1]} : vector<8x512xf32> to vector<8x128xf32>
    %14 = vector.extract_strided_slice %12 {offsets = [0, 128], sizes = [8, 128], strides = [1, 1]} : vector<8x512xf32> to vector<8x128xf32>
    %15 = vector.extract_strided_slice %12 {offsets = [0, 256], sizes = [8, 128], strides = [1, 1]} : vector<8x512xf32> to vector<8x128xf32>
    %16 = vector.extract_strided_slice %12 {offsets = [0, 384], sizes = [8, 128], strides = [1, 1]} : vector<8x512xf32> to vector<8x128xf32>
    %cst_11 = arith.constant 0.000000e+00 : f32
    %17 = vector.broadcast %cst_11 : f32 to vector<8x128xf32>
    %18 = arith.maximumf %14, %17 : vector<8x128xf32>
    %19 = vector.broadcast %cst_11 : f32 to vector<8x128xf32>
    %20 = arith.subf %14, %19 : vector<8x128xf32>
    %21 = arith.cmpf one, %20, %20 : vector<8x128xf32>
    %22 = vector.broadcast %cst_11 : f32 to vector<8x128xf32>
    %23 = arith.addf %14, %22 : vector<8x128xf32>
    %24 = math.absf %20 : vector<8x128xf32>
    %cst_12 = arith.constant 0.000000e+00 : f32
    %25 = vector.broadcast %cst_12 : f32 to vector<8x128xf32>
    %26 = arith.subf %25, %24 : vector<8x128xf32>
    %27 = math.exp %26 : vector<8x128xf32>
    %28 = math.log1p %27 : vector<8x128xf32>
    %29 = arith.addf %18, %28 : vector<8x128xf32>
    %30 = arith.select %21, %23, %29 : vector<8x128xi1>, vector<8x128xf32>
    %cst_13 = arith.constant 1.000000e-07 : f32
    %31 = vector.broadcast %cst_13 : f32 to vector<8x128xf32>
    %32 = arith.addf %30, %31 : vector<8x128xf32>
    %cst_14 = arith.constant 0.000000e+00 : f32
    %33 = vector.broadcast %cst_14 : f32 to vector<8x128xf32>
    %34 = arith.maximumf %16, %33 : vector<8x128xf32>
    %35 = vector.broadcast %cst_14 : f32 to vector<8x128xf32>
    %36 = arith.subf %16, %35 : vector<8x128xf32>
    %37 = arith.cmpf one, %36, %36 : vector<8x128xf32>
    %38 = vector.broadcast %cst_14 : f32 to vector<8x128xf32>
    %39 = arith.addf %16, %38 : vector<8x128xf32>
    %40 = math.absf %36 : vector<8x128xf32>
    %cst_15 = arith.constant 0.000000e+00 : f32
    %41 = vector.broadcast %cst_15 : f32 to vector<8x128xf32>
    %42 = arith.subf %41, %40 : vector<8x128xf32>
    %43 = math.exp %42 : vector<8x128xf32>
    %44 = math.log1p %43 : vector<8x128xf32>
    %45 = arith.addf %34, %44 : vector<8x128xf32>
    %46 = arith.select %37, %39, %45 : vector<8x128xi1>, vector<8x128xf32>
    %cst_16 = arith.constant 1.000000e-07 : f32
    %47 = vector.broadcast %cst_16 : f32 to vector<8x128xf32>
    %48 = arith.addf %46, %47 : vector<8x128xf32>
    %49 = math.log %32 : vector<8x128xf32>
    %50 = math.log %48 : vector<8x128xf32>
    %51 = tpu.reciprocal %48 : vector<8x128xf32> -> vector<8x128xf32>
    %c0_17 = arith.constant 0 : index
    %c0_18 = arith.constant 0 : index
    %52 = vector.load %arg2[%c0_17, %c0_18] : memref<8x128xf32, #tpu.memory_space<vmem>>, vector<8x128xf32>
    %53 = arith.mulf %32, %52 : vector<8x128xf32>
    %54 = arith.addf %13, %53 : vector<8x128xf32>
    %55 = arith.subf %54, %15 : vector<8x128xf32>
    %56 = arith.mulf %55, %51 : vector<8x128xf32>
    %57 = arith.mulf %56, %56 : vector<8x128xf32>
    %58 = arith.mulf %52, %52 : vector<8x128xf32>
    %59 = arith.subf %57, %58 : vector<8x128xf32>
    %cst_19 = arith.constant 5.000000e-01 : f32
    %60 = vector.broadcast %cst_19 : f32 to vector<8x128xf32>
    %61 = arith.mulf %60, %59 : vector<8x128xf32>
    %62 = arith.subf %50, %49 : vector<8x128xf32>
    %63 = arith.addf %61, %62 : vector<8x128xf32>
    %64 = tpu.iota {dimensions = array<i32: 1>} : vector<8x128xi32>
    %c2_i32 = arith.constant 2 : i32
    %65 = vector.broadcast %c2_i32 : i32 to vector<8x128xi32>
    %66 = arith.cmpi slt, %64, %65 : vector<8x128xi32>
    %cst_20 = arith.constant 0.000000e+00 : f32
    %67 = vector.broadcast %cst_20 : f32 to vector<8x128xf32>
    %68 = arith.select %66, %63, %67 : vector<8x128xi1>, vector<8x128xf32>
    %cst_21 = arith.constant dense<0.000000e+00> : vector<8xf32>
    %69 = vector.multi_reduction <add>, %68, %cst_21 [1] : vector<8x128xf32> to vector<8xf32>
    %70 = vector.shape_cast %69 : vector<8xf32> to vector<8x1xf32>
    %c2_i32_22 = arith.constant 2 : i32
    %71 = vector.broadcast %c2_i32_22 : i32 to vector<8x128xi32>
    %72 = arith.cmpi sge, %64, %71 : vector<8x128xi32>
    %c4_i32 = arith.constant 4 : i32
    %73 = vector.broadcast %c4_i32 : i32 to vector<8x128xi32>
    %74 = arith.cmpi slt, %64, %73 : vector<8x128xi32>
    %75 = arith.andi %72, %74 : vector<8x128xi1>
    %cst_23 = arith.constant 0.000000e+00 : f32
    %76 = vector.broadcast %cst_23 : f32 to vector<8x128xf32>
    %77 = arith.select %75, %63, %76 : vector<8x128xi1>, vector<8x128xf32>
    %cst_24 = arith.constant dense<0.000000e+00> : vector<8xf32>
    %78 = vector.multi_reduction <add>, %77, %cst_24 [1] : vector<8x128xf32> to vector<8xf32>
    %79 = vector.shape_cast %78 : vector<8xf32> to vector<8x1xf32>
    %c64_i32 = arith.constant 64 : i32
    %80 = vector.broadcast %c64_i32 : i32 to vector<8x128xi32>
    %81 = arith.cmpi slt, %64, %80 : vector<8x128xi32>
    %82 = arith.negf %70 : vector<8x1xf32>
    %83 = math.exp %82 : vector<8x1xf32>
    %cst_25 = arith.constant 1.000000e+00 : f32
    %84 = vector.broadcast %cst_25 : f32 to vector<8x1xf32>
    %85 = arith.addf %84, %83 : vector<8x1xf32>
    %86 = arith.divf %84, %85 : vector<8x1xf32>
    %87 = arith.negf %79 : vector<8x1xf32>
    %88 = math.exp %87 : vector<8x1xf32>
    %cst_26 = arith.constant 1.000000e+00 : f32
    %89 = vector.broadcast %cst_26 : f32 to vector<8x1xf32>
    %90 = arith.addf %89, %88 : vector<8x1xf32>
    %91 = arith.divf %89, %90 : vector<8x1xf32>
    %92 = vector.shape_cast %86 : vector<8x1xf32> to vector<8x1xf32>
    %93 = vector.broadcast %92 : vector<8x1xf32> to vector<8x128xf32>
    %94 = vector.shape_cast %91 : vector<8x1xf32> to vector<8x1xf32>
    %95 = vector.broadcast %94 : vector<8x1xf32> to vector<8x128xf32>
    %96 = arith.select %81, %93, %95 : vector<8x128xi1>, vector<8x128xf32>
    %c0_27 = arith.constant 0 : index
    %c0_28 = arith.constant 0 : index
    %97 = vector.load %arg7[%c0_27, %c0_28] : memref<8x128xf32, #tpu.memory_space<vmem>>, vector<8x128xf32>
    tpu.vector_store %arg7[%c0_27, %c0_28], %96 {strides = array<i32>} : memref<8x128xf32, #tpu.memory_space<vmem>>, vector<8x128xf32>,
    return
  }
  func.func @transform_0(%arg0: i32) -> (i32, i32) {
    %c0_i32 = arith.constant 0 : i32
    %c0_i32_0 = arith.constant 0 : i32
    return %arg0, %c0_i32 : i32, i32
  }
  func.func @transform_1(%arg0: i32) -> (i32, i32) {
    %c0_i32 = arith.constant 0 : i32
    %c0_i32_0 = arith.constant 0 : i32
    return %arg0, %c0_i32 : i32, i32
  }
  func.func @transform_2(%arg0: i32) -> (i32, i32) {
    %c0_i32 = arith.constant 0 : i32
    %c0_i32_0 = arith.constant 0 : i32
    %c0_i32_1 = arith.constant 0 : i32
    return %c0_i32, %c0_i32_0 : i32, i32
  }
  func.func @transform_3(%arg0: i32) -> (i32, i32) {
    %c0_i32 = arith.constant 0 : i32
    %c0_i32_0 = arith.constant 0 : i32
    %c0_i32_1 = arith.constant 0 : i32
    return %c0_i32, %c0_i32_0 : i32, i32
  }
  func.func @transform_4(%arg0: i32) -> (i32, i32) {
    %c0_i32 = arith.constant 0 : i32
    %c0_i32_0 = arith.constant 0 : i32
    %c0_i32_1 = arith.constant 0 : i32
    return %c0_i32, %c0_i32_0 : i32, i32
  }
  func.func @transform_5(%arg0: i32) -> (i32, i32) {
    %c0_i32 = arith.constant 0 : i32
    %c0_i32_0 = arith.constant 0 : i32
    %c0_i32_1 = arith.constant 0 : i32
    return %c0_i32, %c0_i32_0 : i32, i32
  }
  func.func @transform_6(%arg0: i32) -> (i32, i32) {
    %c0_i32 = arith.constant 0 : i32
    %c0_i32_0 = arith.constant 0 : i32
    return %arg0, %c0_i32 : i32, i32
  }
}

</mosaic_0001>

<bundles_post_ra>
// kernel: tpu_custom_call.1
= control target key start
LH: loop header
LB: loop body
LE: loop exit
PB: predicated region body
PF: predicated region fallthrough
CT: control target
= control target key end

     0   :  { %11 = vsyncpa [#allocation3], 0  ;;  %s780_s0 = inlined_call_operand.hbm [shape: f32[8,128], index: 0, kind: input, shape index: {}]   ;;  %s781_s1 = inlined_call_operand.hbm [shape: f32[8,128], index: 1, kind: input, shape index: {}]   ;;  %s782_s2 = inlined_call_operand.hbm [shape: f32[128,128], index: 2, kind: input, shape index: {}]   ;;  %s783_s3 = inlined_call_operand.vmem [shape: f32[1,128], index: 3, kind: input, shape index: {}]   ;;  %s784_s4 = inlined_call_operand.hbm [shape: f32[128,512], index: 4, kind: input, shape index: {}]   ;;  %s785_s5 = inlined_call_operand.vmem [shape: f32[1,512], index: 5, kind: input, shape index: {}]   ;;  %s786_s6 = inlined_call_operand.hbm [shape: f32[8,128], index: 6, kind: output, shape index: {}]  }
   0x1   :  { %12 = vsyncpa [#allocation6], 0 }
   0x2   :  { %13 = vsyncpa [#allocation9], 0 }
   0x3   :  { %14 = vsyncpa [#allocation4], 0  ;;  %s692_s21 = smov [#allocation5]   ;;  %s693_s23 = smov [#allocation2]  }
   0x4   :  { %s31_s22 = sshll.u32 %s692_s21, 4  ;;  %s21_s24 = sshll.u32 %s693_s23, 4  ;;  %s32_s22 = int_to_ptr.vmem [resolvable:$true] %s31_s22  ;;  %s22_s24 = int_to_ptr.vmem [resolvable:$true] %s21_s24 }
   0x5   :  { %s592_s25 = scalar_lea.vmem %s32_s22, 128  ;;  %p597_p1 = scmp.lt.s32.totalorder %s32_s22, %s32_s22 }
   0x6   :  { %p593_p0 = scmp.ne.s32.totalorder %s32_s22, %s592_s25  ;;  %p598_p2 = scmp.lt.s32.totalorder %s592_s25, %s592_s25 }
   0x8   :  { %p599_p3 = por %p598_p2, %p597_p1 }
   0xa   :  { %p600_p4 = pnand %p599_p3, %p593_p0 }
   0xc   :  { %603 = shalt.err (!%p600_p4)
}
   0xd   :  { %34 = dma.hbm_to_vmem [thread:$0]  %s781_s1, 128, %s32_s22, [#allocation6]  }
   0xe   :  { %s612_s28 = scalar_lea.vmem %s22_s24, 128  ;;  %p617_p6 = scmp.lt.s32.totalorder %s22_s24, %s22_s24 }
   0xf   :  { %p613_p5 = scmp.ne.s32.totalorder %s22_s24, %s612_s28  ;;  %p618_p7 = scmp.lt.s32.totalorder %s612_s28, %s612_s28 }
  0x11   :  { %p619_p8 = por %p618_p7, %p617_p6 }
  0x13   :  { %p620_p9 = pnand %p619_p8, %p613_p5 }
  0x15   :  { %623 = shalt.err (!%p620_p9)
}
  0x16   :  { %24 = dma.hbm_to_vmem [thread:$0]  %s780_s0, 128, %s22_s24, [#allocation3]  }
  0x17   :  { %s694_s7 = smov [#allocation7]  }
  0x18   :  { %s40_s8 = sshll.u32 %s694_s7, 4  ;;  %s41_s8 = int_to_ptr.vmem [resolvable:$true] %s40_s8 }
  0x19   :  { %s632_s9 = scalar_lea.vmem %s41_s8, 2048  ;;  %p637_p11 = scmp.lt.s32.totalorder %s41_s8, %s41_s8 }
  0x1a   :  { %p633_p10 = scmp.ne.s32.totalorder %s41_s8, %s632_s9  ;;  %p638_p12 = scmp.lt.s32.totalorder %s632_s9, %s632_s9 }
  0x1c   :  { %p639_p13 = por %p638_p12, %p637_p11 }
  0x1e   :  { %p640_p0 = pnand %p639_p13, %p633_p10 }
  0x20   :  { %643 = shalt.err (!%p640_p0)
}
  0x21   :  { %s695_s1 = smov 128   ;;  %s696_s10 = smov 8  }
  0x22   :  { %46 = dma.hbm_to_vmem [thread:$0]  %s782_s2, 2048, %s41_s8, [#allocation6], %s695_s1, %s695_s1, %s696_s10  }
  0x23   :  { %s697_s13 = smov [#allocation8]  }
  0x24   :  { %s54_s14 = sshll.u32 %s697_s13, 4  ;;  %s55_s14 = int_to_ptr.vmem [resolvable:$true] %s54_s14 }
  0x25   :  { %s652_s0 = scalar_lea.vmem %s55_s14, 8192  ;;  %p657_p2 = scmp.lt.s32.totalorder %s55_s14, %s55_s14 }
  0x26   :  { %p653_p1 = scmp.ne.s32.totalorder %s55_s14, %s652_s0  ;;  %p658_p3 = scmp.lt.s32.totalorder %s652_s0, %s652_s0 }
  0x28   :  { %p659_p4 = por %p658_p3, %p657_p2 }
  0x2a   :  { %p660_p5 = pnand %p659_p4, %p653_p1 }
  0x2c   :  { %663 = shalt.err (!%p660_p5)
}
  0x2d   :  { %s698_s15 = smov 512   ;;  %s699_s16 = smov 32  }
  0x2e   :  { %60 = dma.hbm_to_vmem [thread:$0]  %s784_s4, 8192, %s55_s14, [#allocation9], %s698_s15, %s698_s15, %s699_s16  }
  0x2f   :  { %684 = dma.done.wait [#allocation3], 128  }
  0x30   :  { %685 = vsyncadd [#allocation3], 4294967168 }
  0x31   :  { %686 = dma.done.wait [#allocation6], 2176  }
  0x32   :  { %687 = vsyncadd [#allocation6], 4294965120 }
  0x33   :  { %688 = dma.done.wait [#allocation9], 8192  }
  0x34   :  { %689 = vsyncadd [#allocation9], 4294959104  ;;  %v700_v0 = vmov 0.0   ;;  %vm701_vm0 = vmmov 0   ;;  %v91_v1 = vld [vmem:[#allocation7 + $0x78] sm:$0xff]  ;;  %v90_v2 = vld [vmem:[#allocation7 + $0x70] sm:$0xff] }
  0x35   :  { %516 = vmatprep.subr.mxu0 %v700_v0  ;;  %548 = vmatprep.mubr.msk.f32.mxu0 %vm701_vm0, %v700_v0  ;;  %v89_v3 = vld [vmem:[#allocation7 + $0x68] sm:$0xff]  ;;  %v88_v4 = vld [vmem:[#allocation7 + $0x60] sm:$0xff]  ;;  %v87_v6 = vld [vmem:[#allocation7 + $0x58] sm:$0xff] }
  0x36   :  { %320 = vmatprep.mubr.f32.mxu1 %v700_v0  ;;  %517 = vmatpush3.msra.mxu0 %v91_v1  ;;  %v231_v5 = vld [vmem:[#allocation8 + $0x1e8] sm:$0xff]  ;;  %v230_v7 = vld [vmem:[#allocation8 + $0x1e0] sm:$0xff]  ;;  %v86_v10 = vld [vmem:[#allocation7 + $0x50] sm:$0xff] }
  0x37   :  { %518 = vmatprep.subr.mxu0 %v700_v0  ;;  %256 = vmatprep.subr.mxu1 %v231_v5  ;;  %v227_v8 = vld [vmem:[#allocation8 + $0x1c8] sm:$0xff]  ;;  %v226_v9 = vld [vmem:[#allocation8 + $0x1c0] sm:$0xff]  ;;  %v83_v20 = vld [vmem:[#allocation7 + $0x38] sm:$0xff] }
  0x38   :  { %519 = vmatpush3.msra.mxu0 %v90_v2  ;;  %257 = vmatpush1.msra.mxu1 %v230_v7  ;;  %v223_v11 = vld [vmem:[#allocation8 + $0x1a8] sm:$0xff]  ;;  %v222_v12 = vld [vmem:[#allocation8 + $0x1a0] sm:$0xff]  ;;  %v82_v23 = vld [vmem:[#allocation7 + $0x30] sm:$0xff] }
  0x39   :  { %520 = vmatprep.subr.mxu0 %v700_v0  ;;  %258 = vmatprep.subr.mxu1 %v227_v8  ;;  %v219_v13 = vld [vmem:[#allocation8 + $0x188] sm:$0xff]  ;;  %v218_v15 = vld [vmem:[#allocation8 + $0x180] sm:$0xff]  ;;  %v79_v32 = vld [vmem:[#allocation7 + $0x18] sm:$0xff] }
  0x3a   :  { %521 = vmatpush3.msra.mxu0 %v89_v3  ;;  %259 = vmatpush1.msra.mxu1 %v226_v9  ;;  %v85_v14 = vld [vmem:[#allocation7 + $0x48] sm:$0xff]  ;;  %v84_v17 = vld [vmem:[#allocation7 + $0x40] sm:$0xff]  ;;  %v78_v35 = vld [vmem:[#allocation7 + $0x10] sm:$0xff] }
  0x3b   :  { %522 = vmatprep.subr.mxu0 %v700_v0  ;;  %260 = vmatprep.subr.mxu1 %v223_v11  ;;  %v215_v16 = vld [vmem:[#allocation8 + $0x168] sm:$0xff]  ;;  %v214_v18 = vld [vmem:[#allocation8 + $0x160] sm:$0xff]  ;;  %v75_v43 = vld [vmem:[#allocation2] sm:$0xff] }
  0x3c   :  { %523 = vmatpush3.msra.mxu0 %v88_v4  ;;  %261 = vmatpush1.msra.mxu1 %v222_v12  ;;  %v211_v19 = vld [vmem:[#allocation8 + $0x148] sm:$0xff]  ;;  %v210_v21 = vld [vmem:[#allocation8 + $0x140] sm:$0xff]  ;;  %v233_v44 = vld [vmem:[#allocation8 + $0x1f8] sm:$0xff] }
  0x3d   :  { %524 = vmatprep.subr.mxu0 %v700_v0  ;;  %262 = vmatprep.subr.mxu1 %v219_v13  ;;  %v207_v22 = vld [vmem:[#allocation8 + $0x128] sm:$0xff]  ;;  %v206_v24 = vld [vmem:[#allocation8 + $0x120] sm:$0xff]  ;;  %v232_v45 = vld [vmem:[#allocation8 + $0x1f0] sm:$0xff] }
  0x3e   :  { %525 = vmatpush3.msra.mxu0 %v87_v6  ;;  %263 = vmatpush1.msra.mxu1 %v218_v15  ;;  %v203_v25 = vld [vmem:[#allocation8 + $0x108] sm:$0xff]  ;;  %v202_v27 = vld [vmem:[#allocation8 + $0x100] sm:$0xff]  ;;  %v229_v47 = vld [vmem:[#allocation8 + $0x1d8] sm:$0xff] }
  0x3f   :  { %526 = vmatprep.subr.mxu0 %v700_v0  ;;  %264 = vmatprep.subr.mxu1 %v215_v16  ;;  %v81_v26 = vld [vmem:[#allocation7 + $0x28] sm:$0xff]  ;;  %v80_v29 = vld [vmem:[#allocation7 + $0x20] sm:$0xff]  ;;  %v228_v48 = vld [vmem:[#allocation8 + $0x1d0] sm:$0xff] }
  0x40   :  { %527 = vmatpush3.msra.mxu0 %v86_v10  ;;  %265 = vmatpush1.msra.mxu1 %v214_v18  ;;  %v199_v28 = vld [vmem:[#allocation8 + $0xe8] sm:$0xff]  ;;  %v198_v30 = vld [vmem:[#allocation8 + $0xe0] sm:$0xff]  ;;  %v225_v49 = vld [vmem:[#allocation8 + $0x1b8] sm:$0xff] }
  0x41   :  { %528 = vmatprep.subr.mxu0 %v700_v0  ;;  %266 = vmatprep.subr.mxu1 %v211_v19  ;;  %v195_v31 = vld [vmem:[#allocation8 + $0xc8] sm:$0xff]  ;;  %v194_v33 = vld [vmem:[#allocation8 + $0xc0] sm:$0xff]  ;;  %v224_v50 = vld [vmem:[#allocation8 + $0x1b0] sm:$0xff] }
  0x42   :  { %529 = vmatpush3.msra.mxu0 %v85_v14  ;;  %267 = vmatpush1.msra.mxu1 %v210_v21  ;;  %v191_v34 = vld [vmem:[#allocation8 + $0xa8] sm:$0xff]  ;;  %v190_v36 = vld [vmem:[#allocation8 + $0xa0] sm:$0xff]  ;;  %v221_v51 = vld [vmem:[#allocation8 + $0x198] sm:$0xff] }
  0x43   :  { %530 = vmatprep.subr.mxu0 %v700_v0  ;;  %268 = vmatprep.subr.mxu1 %v207_v22  ;;  %v187_v37 = vld [vmem:[#allocation8 + $0x88] sm:$0xff]  ;;  %v186_v39 = vld [vmem:[#allocation8 + $0x80] sm:$0xff]  ;;  %v220_v52 = vld [vmem:[#allocation8 + $0x190] sm:$0xff] }
  0x44   :  { %531 = vmatpush3.msra.mxu0 %v84_v17  ;;  %269 = vmatpush1.msra.mxu1 %v206_v24  ;;  %v77_v38 = vld [vmem:[#allocation7 + $0x8] sm:$0xff]  ;;  %v76_v41 = vld [vmem:[#allocation7] sm:$0xff]  ;;  %v217_v53 = vld [vmem:[#allocation8 + $0x178] sm:$0xff] }
  0x45   :  { %532 = vmatprep.subr.mxu0 %v700_v0  ;;  %270 = vmatprep.subr.mxu1 %v203_v25  ;;  %v183_v40 = vld [vmem:[#allocation8 + $0x68] sm:$0xff]  ;;  %v182_v42 = vld [vmem:[#allocation8 + $0x60] sm:$0xff]  ;;  %v216_v54 = vld [vmem:[#allocation8 + $0x170] sm:$0xff] }
  0x46   :  { %533 = vmatpush3.msra.mxu0 %v83_v20  ;;  %271 = vmatpush1.msra.mxu1 %v202_v27  ;;  %v179_v46 = vld [vmem:[#allocation8 + $0x48] sm:$0xff]  ;;  %v213_v55 = vld [vmem:[#allocation8 + $0x158] sm:$0xff]  ;;  %v212_v56 = vld [vmem:[#allocation8 + $0x150] sm:$0xff] }
  0x47   :  { %534 = vmatprep.subr.mxu0 %v700_v0  ;;  %272 = vmatprep.subr.mxu1 %v199_v28  ;;  %v209_v57 = vld [vmem:[#allocation8 + $0x138] sm:$0xff]  ;;  %v208_v58 = vld [vmem:[#allocation8 + $0x130] sm:$0xff]  ;;  %v178_v8 = vld [vmem:[#allocation8 + $0x40] sm:$0xff] }
  0x48   :  { %535 = vmatpush3.msra.mxu0 %v82_v23  ;;  %273 = vmatpush1.msra.mxu1 %v198_v30  ;;  %v205_v59 = vld [vmem:[#allocation8 + $0x118] sm:$0xff]  ;;  %v204_v60 = vld [vmem:[#allocation8 + $0x110] sm:$0xff]  ;;  %v175_v10 = vld [vmem:[#allocation8 + $0x28] sm:$0xff]  ;;  %v236_v23 = vlaneseq }
  0x49   :  { %536 = vmatprep.subr.mxu0 %v700_v0  ;;  %274 = vmatprep.subr.mxu1 %v195_v31  ;;  %v201_v61 = vld [vmem:[#allocation8 + $0xf8] sm:$0xff]  ;;  %v200_v62 = vld [vmem:[#allocation8 + $0xf0] sm:$0xff]  ;;  %v174_v12 = vld [vmem:[#allocation8 + $0x20] sm:$0xff] }
  0x4a   :  { %537 = vmatpush3.msra.mxu0 %v81_v26  ;;  %275 = vmatpush1.msra.mxu1 %v194_v33  ;;  %v197_v63 = vld [vmem:[#allocation8 + $0xd8] sm:$0xff]  ;;  %v192_v2 = vld [vmem:[#allocation8 + $0xb0] sm:$0xff]  ;;  %v171_v14 = vld [vmem:[#allocation8 + $0x8] sm:$0xff]  ;;  %v237_v24 = vshrl.u32 %v236_v23, 7 }
  0x4b   :  { %538 = vmatprep.subr.mxu0 %v700_v0  ;;  %276 = vmatprep.subr.mxu1 %v191_v34  ;;  %v193_v1 = vld [vmem:[#allocation8 + $0xb8] sm:$0xff]  ;;  %v188_v4 = vld [vmem:[#allocation8 + $0x90] sm:$0xff]  ;;  %v170_v16 = vld [vmem:[#allocation8] sm:$0xff] }
  0x4c   :  { %539 = vmatpush3.msra.mxu0 %v80_v29  ;;  %277 = vmatpush1.msra.mxu1 %v190_v36  ;;  %v189_v3 = vld [vmem:[#allocation8 + $0x98] sm:$0xff]  ;;  %v184_v6 = vld [vmem:[#allocation8 + $0x70] sm:$0xff]  ;;  %v242_v25 = vsub.s32 1, %v237_v24  ;;  %v250_v26 = vsub.s32 3, %v237_v24 }
  0x4d   :  { %540 = vmatprep.subr.mxu0 %v700_v0  ;;  %278 = vmatprep.subr.mxu1 %v187_v37  ;;  %v185_v5 = vld [vmem:[#allocation8 + $0x78] sm:$0xff]  ;;  %v180_v9 = vld [vmem:[#allocation8 + $0x50] sm:$0xff] }
  0x4e   :  { %541 = vmatpush3.msra.mxu0 %v79_v32  ;;  %279 = vmatpush1.msra.mxu1 %v186_v39  ;;  %v181_v7 = vld [vmem:[#allocation8 + $0x58] sm:$0xff]  ;;  %v176_v13 = vld [vmem:[#allocation8 + $0x30] sm:$0xff] }
  0x4f   :  { %542 = vmatprep.subr.mxu0 %v700_v0  ;;  %280 = vmatprep.subr.mxu1 %v183_v40  ;;  %v177_v11 = vld [vmem:[#allocation8 + $0x38] sm:$0xff]  ;;  %v172_v17 = vld [vmem:[#allocation8 + $0x10] sm:$0xff] }
  0x50   :  { %543 = vmatpush3.msra.mxu0 %v78_v35  ;;  %281 = vmatpush1.msra.mxu1 %v182_v42  ;;  %v173_v15 = vld [vmem:[#allocation8 + $0x18] sm:$0xff]  ;;  %v496_v18 = vld [vmem:[%s783_s3] ss:$0 sm:$0xff]  ;;  %s702_s3 = smov [#allocation10]  }
  0x51   :  { %544 = vmatprep.subr.mxu0 %v700_v0  ;;  %282 = vmatprep.subr.mxu1 %v179_v46  ;;  %v234_v27 = vld [vmem:[%s785_s5] sm:$0xf]  ;;  %s485_s5 = sshll.u32 %s702_s3, 4  ;;  %s486_s5 = int_to_ptr.vmem [resolvable:$true] %s485_s5 }
  0x52   :  { %545 = vmatpush3.msra.mxu0 %v77_v38  ;;  %283 = vmatpush1.msra.mxu1 %v178_v8  ;;  %v243_v28 = vrot.slane %v234_v27, %v242_v25  ;;  %v251_v29 = vrot.slane %v234_v27, %v250_v26  ;;  %s664_s21 = scalar_lea.vmem %s486_s5, 128  ;;  %p669_p7 = scmp.lt.s32.totalorder %s486_s5, %s486_s5 }
  0x53   :  { %546 = vmatprep.subr.mxu0 %v700_v0  ;;  %284 = vmatprep.subr.mxu1 %v175_v10  ;;  %p665_p6 = scmp.ne.s32.totalorder %s486_s5, %s664_s21  ;;  %p670_p8 = scmp.lt.s32.totalorder %s664_s21, %s664_s21 }
  0x54   :  { %547 = vmatpush3.msra.mxu0 %v76_v41  ;;  %285 = vmatpush1.msra.mxu1 %v174_v12 }
  0x55   :  { %549 = vmatmul.mubr.f32.vlgmr.msra.gmra.mxu0 %v75_v43  ;;  %327 = vmatprep.subr.mxu0 %v233_v44  ;;  %p671_p9 = por %p670_p8, %p669_p7 }
  0x56   :  { %328 = vmatpush1.msra.mxu0 %v232_v45  ;;  %391 = vmatprep.mubr.f32.mxu0 %v700_v0  ;;  %v196_v0 = vld [vmem:[#allocation8 + $0xd0] sm:$0xff] }
  0x57   :  { %329 = vmatprep.subr.mxu0 %v229_v47  ;;  %286 = vmatprep.subr.mxu1 %v171_v14  ;;  %p672_p10 = pnand %p671_p9, %p665_p6 }
  0x58   :  { %330 = vmatpush1.msra.mxu0 %v228_v48  ;;  %287 = vmatpush1.msra.mxu1 %v170_v16 }
  0x59   :  { %331 = vmatprep.subr.mxu0 %v225_v49 }
  0x5a   :  { %332 = vmatpush1.msra.mxu0 %v224_v50 }
  0x5b   :  { %333 = vmatprep.subr.mxu0 %v221_v51 }
  0x5c   :  { %334 = vmatpush1.msra.mxu0 %v220_v52 }
  0x5d   :  { %335 = vmatprep.subr.mxu0 %v217_v53 }
  0x5e   :  { %336 = vmatpush1.msra.mxu0 %v216_v54 }
  0x5f   :  { %337 = vmatprep.subr.mxu0 %v213_v55 }
  0x60   :  { %338 = vmatpush1.msra.mxu0 %v212_v56 }
  0x61   :  { %339 = vmatprep.subr.mxu0 %v209_v57 }
  0x62   :  { %340 = vmatpush1.msra.mxu0 %v208_v58 }
  0x63   :  { %341 = vmatprep.subr.mxu0 %v205_v59 }
  0x64   :  { %342 = vmatpush1.msra.mxu0 %v204_v60 }
  0x65   :  { %343 = vmatprep.subr.mxu0 %v201_v61 }
  0x66   :  { %344 = vmatpush1.msra.mxu0 %v200_v62 }
  0x67   :  { %345 = vmatprep.subr.mxu0 %v197_v63 }
  0x68   :  { %346 = vmatpush1.msra.mxu0 %v196_v0 }
  0x69   :  { %347 = vmatprep.subr.mxu0 %v193_v1 }
  0x6a   :  { %348 = vmatpush1.msra.mxu0 %v192_v2 }
  0x6b   :  { %349 = vmatprep.subr.mxu0 %v189_v3  ;;  %v238_v3 = vsub.s32 0, %v237_v24 }
  0x6c   :  { %350 = vmatpush1.msra.mxu0 %v188_v4 }
  0x6d   :  { %351 = vmatprep.subr.mxu0 %v185_v5  ;;  %v441_v5 = vld [vmem:[#allocation5] sm:$0xff] }
  0x6e   :  { %352 = vmatpush1.msra.mxu0 %v184_v6  ;;  %v239_v6 = vrot.slane %v234_v27, %v238_v3 }
  0x6f   :  { %353 = vmatprep.subr.mxu0 %v181_v7  ;;  %v246_v7 = vsub.s32 2, %v237_v24 }
  0x70   :  { %354 = vmatpush1.msra.mxu0 %v180_v9 }
  0x71   :  { %355 = vmatprep.subr.mxu0 %v177_v11  ;;  %v247_v10 = vrot.slane %v234_v27, %v246_v7 }
  0x72   :  { %356 = vmatpush1.msra.mxu0 %v176_v13 }
  0x73   :  { %357 = vmatprep.subr.mxu0 %v173_v15 }
  0x74   :  { %358 = vmatpush1.msra.mxu0 %v172_v17 }
 0x115   :  { %v165_v19 = vpop.f32.mrf.mxu0 }
 0x116   :  { %v166_v20 = vadd.f32 %v496_v18, %v165_v19  ;;  %v447_v18 = vmul.f32 %v441_v5, %v441_v5 }
 0x117   :  { %v550_v21 = vpop.f32.mrf.mxu0 }
 0x118   :  { %v169_v22 = vmax.f32 %v166_v20, 0.0 }
 0x11a   :  { %321 = vmatmul.mubr.f32.vlgmr.msra.gmra.mxu1 %v169_v22  ;;  %392 = vmatmul.mubr.f32.vlgmr.msra.gmra.mxu0 %v169_v22  ;;  %v453_v22 = vand.u32 127, %v236_v23 }
 0x11c   :  { %vm454_vm5 = vcmp.lt.s32.totalorder %v453_v22, 2  ;;  %vm458_vm6 = vcmp.ge.s32.totalorder %v453_v22, 2  ;;  %vm459_vm7 = vcmp.lt.s32.totalorder %v453_v22, 4  ;;  %vm464_vm9 = vcmp.lt.s32.totalorder %v453_v22, 64 }
 0x11d   :  { %vm460_vm8 = vmand %vm458_vm6, %vm459_vm7 }
 0x1da   :  { %v322_v30 = vpop.f32.mrf.mxu1  ;;  %v393_v31 = vpop.f32.mrf.mxu0 }
 0x1db   :  { %v323_v9 = vadd.f32 %v322_v30, %v239_v6  ;;  %v394_v12 = vadd.f32 %v393_v31, %v247_v10 }
 0x1dc   :  { %v324_v32 = vpop.f32.mrf.mxu1  ;;  %v395_v33 = vpop.f32.mrf.mxu0 }
 0x1dd   :  { %v325_v34 = vadd.f32 %v324_v32, %v243_v28  ;;  %v396_v35 = vadd.f32 %v395_v33, %v251_v29 }
 0x1df   :  { %v401_v36 = vand.u32 2147483647, %v325_v34  ;;  %v420_v37 = vand.u32 2147483647, %v396_v35  ;;  %v398_v56 = vmax.f32 %v325_v34, 0.0  ;;  %v417_v60 = vmax.f32 %v396_v35, 0.0 }
 0x1e0   :  { %vm399_vm3 = vcmp.ne.f32.partialorder %v325_v34, %v325_v34  ;;  %vm418_vm4 = vcmp.ne.f32.partialorder %v396_v35, %v396_v35 }
 0x1e1   :  { %v402_v38 = vsub.f32 0.0, %v401_v36  ;;  %v421_v39 = vsub.f32 0.0, %v420_v37 }
 0x1e3   :  { %v403_v40 = vmul.f32 1.442695, %v402_v38  ;;  %v422_v41 = vmul.f32 1.442695, %v421_v39 }
 0x1e5   :  { %562 = vpow2.f32 %v403_v40 }
 0x1e6   :  { %564 = vpow2.f32 %v422_v41 }
 0x1f2   :  { %v563_v42 = vpop.eup %562 }
 0x1f3   :  { %v565_v43 = vpop.eup %564  ;;  %v405_v44 = vadd.f32 1.0, %v563_v42  ;;  %v408_v46 = vmul.f32 -0.5, %v563_v42  ;;  %v411_v49 = vand.u32 2147483647, %v563_v42 }
 0x1f4   :  { %v424_v45 = vadd.f32 1.0, %v565_v43  ;;  %v427_v47 = vmul.f32 -0.5, %v565_v43  ;;  %v430_v51 = vand.u32 2147483647, %v565_v43 }
 0x1f5   :  { %566 = vlog2.f32 %v405_v44  ;;  %v409_v48 = vadd.f32 1.0, %v408_v46  ;;  %vm412_vm1 = vcmp.lt.f32.partialorder %v411_v49, 0.0004427343 }
 0x1f6   :  { %568 = vlog2.f32 %v424_v45  ;;  %v428_v50 = vadd.f32 1.0, %v427_v47  ;;  %vm431_vm2 = vcmp.lt.f32.partialorder %v430_v51, 0.0004427343 }
 0x1f7   :  { %v410_v55 = vmul.f32 %v563_v42, %v409_v48 }
 0x1f8   :  { %v429_v58 = vmul.f32 %v565_v43, %v428_v50 }
 0x202   :  { %v567_v52 = vpop.eup %566 }
 0x203   :  { %v569_v53 = vpop.eup %568  ;;  %v407_v54 = vmul.f32 0.6931472, %v567_v52 }
 0x204   :  { %v426_v57 = vmul.f32 0.6931472, %v569_v53 }
 0x205   :  { %v413_v59 = vsel %vm412_vm1, %v410_v55, %v407_v54 }
 0x206   :  { %v414_v61 = vadd.f32 %v413_v59, %v398_v56  ;;  %v432_v62 = vsel %vm431_vm2, %v429_v58, %v426_v57 }
 0x207   :  { %v433_v63 = vadd.f32 %v432_v62, %v417_v60 }
 0x208   :  { %v415_v0 = vsel %vm399_vm3, %v325_v34, %v414_v61 }
 0x209   :  { %v416_v1 = vadd.f32 1e-07, %v415_v0  ;;  %v434_v2 = vsel %vm418_vm4, %v396_v35, %v433_v63 }
 0x20a   :  { %v435_v4 = vadd.f32 1e-07, %v434_v2 }
 0x20b   :  { %570 = vlog2.f32 %v416_v1  ;;  %v442_v8 = vmul.f32 %v441_v5, %v416_v1 }
 0x20c   :  { %572 = vrcp.f32 %v435_v4 }
 0x20d   :  { %574 = vlog2.f32 %v435_v4  ;;  %v443_v11 = vadd.f32 %v442_v8, %v323_v9 }
 0x20f   :  { %v444_v14 = vsub.f32 %v443_v11, %v394_v12 }
 0x218   :  { %v571_v13 = vpop.eup %570 }
 0x219   :  { %v573_v15 = vpop.eup %572  ;;  %v437_v19 = vmul.f32 0.6931472, %v571_v13 }
 0x21a   :  { %v575_v16 = vpop.eup %574  ;;  %v445_v17 = vmul.f32 %v573_v15, %v444_v14 }
 0x21b   :  { %v439_v20 = vmul.f32 0.6931472, %v575_v16 }
 0x21c   :  { %v446_v21 = vmul.f32 %v445_v17, %v445_v17 }
 0x21d   :  { %v450_v28 = vsub.f32 %v439_v20, %v437_v19 }
 0x21e   :  { %v448_v25 = vsub.f32 %v446_v21, %v447_v18 }
 0x220   :  { %v449_v26 = vmul.f32 0.5, %v448_v25 }
 0x222   :  { %v451_v24 = vadd.f32 %v450_v28, %v449_v26 }
 0x224   :  { %v455_v27 = vsel %vm454_vm5, %v451_v24, 0.0  ;;  %v461_v29 = vsel %vm460_vm8, %v451_v24, 0.0 }
 0x225   :  { %456 = vadd.xlane.f32.xlu0 %v455_v27 }
 0x229   :  { %462 = vadd.xlane.f32.xlu0 %v461_v29 }
 0x2ae   :  { %v457_v30 = vpop.xlane.xlu0 %456 }
 0x2af   :  { %v497_v31 = vmul.f32 -1.442695, %v457_v30 }
 0x2b1   :  { %576 = vpow2.f32 %v497_v31 }
 0x2b2   :  { %v463_v32 = vpop.xlane.xlu0 %462 }
 0x2b3   :  { %v498_v33 = vmul.f32 -1.442695, %v463_v32 }
 0x2b5   :  { %578 = vpow2.f32 %v498_v33 }
 0x2be   :  { %v577_v34 = vpop.eup %576 }
 0x2bf   :  { %v468_v23 = vadd.f32 1.0, %v577_v34 }
 0x2c1   :  { %580 = vrcp.f32 %v468_v23 }
 0x2c2   :  { %v579_v35 = vpop.eup %578 }
 0x2c3   :  { %v474_v36 = vadd.f32 1.0, %v579_v35 }
 0x2c5   :  { %582 = vrcp.f32 %v474_v36 }
 0x2ce   :  { %v581_v37 = vpop.eup %580 }
 0x2d2   :  { %v583_v38 = vpop.eup %582 }
 0x2d3   :  { %v477_v39 = vsel %vm464_vm9, %v581_v37, %v583_v38 }
 0x2d4   :  { %478 = vst [vmem:[#allocation10] sm:$0xff] %v477_v39 }
 0x2d5   :  { %675 = shalt.err (!%p672_p10)
}
 0x2d6   :  { %488 = dma.vmem_to_hbm [thread:$0]  %s486_s5, 128, %s786_s6, [#allocation4]  }
 0x2d7   :  { %690 = dma.done.wait [#allocation4], 128  }
 0x2d8   :  { %691 = vsyncadd [#allocation4], 4294967168 }
 0x2d9   :  { %492 = vsyncpa [#allocation3], 1 }
 0x2da   :  { %493 = vsyncpa [#allocation6], 1 }
 0x2db   :  { %494 = vsyncpa [#allocation9], 1 }
 0x2dc   :  { %495 = vsyncpa [#allocation4], 1 }

</bundles_post_ra>
